<compile_context>
chip_gen: v7x
topology: tpu7x:2x2x1
jax: 0.10.0
libtpu: 0.0.40
codegen_flags: <defaults>
</compile_context>

<pallas_src>
import jax
import jax.numpy as jnp
from jax.experimental import pallas as pl
from jax.experimental.pallas import tpu as pltpu


# ---------------------------------------------------------------------------
# Kernel body: pure pass-through (the reference module applies no transform).
# ---------------------------------------------------------------------------
def _identity_kernel(x_ref, o_ref):
    o_ref[...] = x_ref[...]


# ---------------------------------------------------------------------------
# Hardware queries (best-effort; conservative fallbacks keep v7x safe).
# ---------------------------------------------------------------------------
def _tpu_vmem_capacity_bytes() -> int:
    try:
        info = pltpu.get_tpu_info()
        cap = getattr(info, "vmem_capacity_bytes", None)
        if cap:
            return int(cap)
    except Exception:
        pass
    return 64 << 20  # conservative fallback == v7x physical VMEM


def _tpu_num_tensorcores() -> int:
    try:
        info = pltpu.get_tpu_info()
        for name in ("num_cores", "core_count", "tensorcore_count", "num_tensorcores"):
            n = getattr(info, name, None)
            if n:
                return int(n)
    except Exception:
        pass
    return 1


def _sublane_multiple(dtype) -> int:
    # Sub-32-bit dtypes pack along sublanes: 8 rows (f32), 16 (bf16), 32 (int8/fp8).
    return max(8, 32 // jnp.dtype(dtype).itemsize)


def _block_caps():
    """Return (per-block byte cap, vmem_limit_bytes) for this TPU generation."""
    cap = _tpu_vmem_capacity_bytes()
    if cap >= (96 << 20):
        # v5e / v6e: 128 MiB physical VMEM. 12 MiB block * ~4 resident buffers
        # = 48 MiB; raise the scoped limit well past v5e's 16 MiB default.
        return 12 << 20, 56 << 20
    # v7x: 64 MiB physical / 32 MiB scoped default. 6 MiB block * 4 = 24 MiB.
    return 6 << 20, 28 << 20


def _choose_blocks(rows: int, cols: int, itemsize: int, sub_mult: int):
    """Pick (block_rows, block_cols, vmem_limit). rows % sub_mult == 0 and
    cols % 128 == 0 are guaranteed by the caller (padding)."""
    block_cap, vmem_limit = _block_caps()

    # Lane (column) block: multiple of 128, <= 8192, dividing cols.
    bc = min(cols, 8192)
    bc -= bc % 128
    bc = max(bc, 128)
    while cols % bc != 0:
        bc -= 128

    # Sublane (row) block: dtype-aware multiple, budget-limited, dividing rows.
    budget_rows = max(sub_mult, block_cap // max(1, bc * itemsize))
    br = min(rows, budget_rows)
    br -= br % sub_mult
    br = max(br, sub_mult)
    while rows % br != 0:
        br -= sub_mult

    return br, bc, vmem_limit


# ---------------------------------------------------------------------------
# Tiled, double-buffered pass-through copy of a 2-D slab (standalone exerciser).
# ---------------------------------------------------------------------------
_SMALL_SLAB_BYTES = 1 << 20  # below this, kernel-launch overhead dominates


def identity_copy_2d(x2d: jax.Array, *, force_pallas: bool = False) -> jax.Array:
    rows, cols = x2d.shape
    nbytes = rows * cols * x2d.dtype.itemsize
    if not force_pallas and nbytes < _SMALL_SLAB_BYTES:
        # Tiny slab: a Pallas launch is strictly slower than doing nothing.
        return x2d

    sub = _sublane_multiple(x2d.dtype)
    pad_r = (-rows) % sub
    pad_c = (-cols) % 128
    xp = jnp.pad(x2d, ((0, pad_r), (0, pad_c))) if (pad_r or pad_c) else x2d
    prows, pcols = xp.shape

    br, bc, vmem_limit = _choose_blocks(prows, pcols, xp.dtype.itemsize, sub)
    grid = (prows // br, pcols // bc)

    # Only engage CORE_PARALLEL when we can positively detect >1 TensorCore
    # (v7x); otherwise fall back to plain PARALLEL (v5e / v6e single-TC).
    row_sem = pltpu.PARALLEL
    if _tpu_num_tensorcores() > 1 and hasattr(pltpu, "CORE_PARALLEL"):
        row_sem = pltpu.CORE_PARALLEL

    out = pl.pallas_call(
        _identity_kernel,
        out_shape=jax.ShapeDtypeStruct((prows, pcols), xp.dtype),
        grid=grid,
        in_specs=[pl.BlockSpec((br, bc), lambda i, j: (i, j))],
        out_specs=pl.BlockSpec((br, bc), lambda i, j: (i, j)),
        compiler_params=pltpu.CompilerParams(
            dimension_semantics=(row_sem, pltpu.ARBITRARY),
            vmem_limit_bytes=vmem_limit,
        ),
    )(xp)

    if pad_r or pad_c:
        out = out[:rows, :cols]
    return out


def identity_copy_nchw(x: jax.Array, *, force_pallas: bool = False) -> jax.Array:
    """Flatten NCHW to a lane-dense (N*C, H*W) slab, copy, restore shape."""
    n, c, h, w = x.shape
    y2d = identity_copy_2d(x.reshape(n * c, h * w), force_pallas=force_pallas)
    return y2d.reshape(n, c, h, w)


# ---------------------------------------------------------------------------
# Module-equivalent forward: YolowPromptBackbone.forward(x) -> None (no ops).
# ---------------------------------------------------------------------------
def yolow_prompt_backbone_forward(x: jax.Array):
    """Exact semantic equivalent of YolowPromptBackbone.forward: returns None.

    The reference module ignores `x` entirely and returns None, so no kernel
    is launched and no device sync is performed here.
    """
    del x
    return None  # matches `forward(self, x): return`


if __name__ == "__main__":
    key = jax.random.PRNGKey(0)
    k0, k1 = jax.random.split(key)

    # Small NCHW input consistent with a detector backbone's image tensor.
    x = jax.random.normal(k0, (2, 4, 16, 16), dtype=jnp.float32)

    # Exercise the tiled Pallas identity kernel (forced: the slab is tiny and
    # would otherwise take the small-slab bypass).
    y = jax.block_until_ready(identity_copy_nchw(x, force_pallas=True))
    assert y.shape == x.shape and y.dtype == x.dtype
    assert bool(jnp.all(y == x))

    # A non-128-aligned spatial size (20x20 = 400 cols) to exercise the
    # lane-padding path (cols padded 400 -> 512, then sliced back).
    x_odd = jax.random.normal(k1, (2, 4, 20, 20), dtype=jnp.float32)
    y_odd = jax.block_until_ready(identity_copy_nchw(x_odd, force_pallas=True))
    assert y_odd.shape == x_odd.shape
    assert bool(jnp.all(y_odd == x_odd))

    # Run the module-equivalent forward; it must return None like PyTorch,
    # and it launches no device work at all.
    out = yolow_prompt_backbone_forward(x)
    assert out is None

    print("KERNEL_OK")
</pallas_src>

<mosaic_0001>
module attributes {stable_mosaic.version = 11 : i64} {
  func.func @_identity_kernel(%arg0: i32, %arg1: i32, %arg2: memref<8x256xf32, #tpu.memory_space<vmem>>, %arg3: memref<8x256xf32, #tpu.memory_space<vmem>>) attributes {dimension_semantics = [#tpu.dimension_semantics<parallel>, #tpu.dimension_semantics<arbitrary>], iteration_bounds = array<i64: 1, 1>, scalar_prefetch = 0 : i64, scratch_operands = 0 : i64, tpu.core_type = #tpu.core_type<tc>, window_params = [{transform_indices = @transform_0, window_bounds = array<i64: 8, 256>}, {transform_indices = @transform_1, window_bounds = array<i64: 8, 256>}]} {
    %c0 = arith.constant 0 : index
    %c0_0 = arith.constant 0 : index
    %0 = vector.load %arg2[%c0, %c0_0] : memref<8x256xf32, #tpu.memory_space<vmem>>, vector<8x256xf32>
    %c0_1 = arith.constant 0 : index
    %c0_2 = arith.constant 0 : index
    %1 = vector.load %arg3[%c0_1, %c0_2] : memref<8x256xf32, #tpu.memory_space<vmem>>, vector<8x256xf32>
    tpu.vector_store %arg3[%c0_1, %c0_2], %0 {strides = array<i32>} : memref<8x256xf32, #tpu.memory_space<vmem>>, vector<8x256xf32>,
    return
  }
  func.func @transform_0(%arg0: i32, %arg1: i32) -> (i32, i32) {
    %c0_i32 = arith.constant 0 : i32
    return %arg0, %arg1 : i32, i32
  }
  func.func @transform_1(%arg0: i32, %arg1: i32) -> (i32, i32) {
    %c0_i32 = arith.constant 0 : i32
    return %arg0, %arg1 : i32, i32
  }
}

</mosaic_0001>

<bundles_post_ra>
// kernel: tpu_custom_call.1
= control target key start
LH: loop header
LB: loop body
LE: loop exit
PB: predicated region body
PF: predicated region fallthrough
CT: control target
= control target key end

     0   :  { %6 = vsyncpa [#allocation3], 0  ;;  %s126_s0 = inlined_call_operand.hbm [shape: f32[8,256], index: 0, kind: input, shape index: {}]   ;;  %s127_s1 = inlined_call_operand.hbm [shape: f32[8,256], index: 1, kind: output, shape index: {}]  }
   0x1   :  { %7 = vsyncpa [#allocation4], 0  ;;  %s90_s6 = smov [#allocation2]   ;;  %s42_s10 = scalar_lea.hbm %s126_s0, 256 }
   0x2   :  { %s14_s7 = sshll.u32 %s90_s6, 4  ;;  %p43_p0 = scmp.ne.s32.totalorder %s126_s0, %s42_s10  ;;  %s15_s7 = int_to_ptr.vmem [resolvable:$true] %s14_s7 }
   0x3   :  { %p46_p1 = scmp.lt.u32.totalorder %s42_s10, %s126_s0 }
   0x5   :  { %p48_p2 = pnand %p46_p1, %p43_p0 }
   0x7   :  { %51 = shalt.err (!%p48_p2)
}
   0x8   :  { %s52_s15 = scalar_lea.vmem %s15_s7, 256  ;;  %p57_p4 = scmp.lt.s32.totalorder %s15_s7, %s15_s7 }
   0x9   :  { %p53_p3 = scmp.ne.s32.totalorder %s15_s7, %s52_s15  ;;  %p58_p5 = scmp.lt.s32.totalorder %s52_s15, %s52_s15 }
   0xb   :  { %p59_p6 = por %p58_p5, %p57_p4 }
   0xd   :  { %p60_p7 = pnand %p59_p6, %p53_p3 }
   0xf   :  { %63 = shalt.err (!%p60_p7)
}
  0x10   :  { %17 = dma.hbm_to_vmem [thread:$0]  %s126_s0, 256, %s15_s7, [#allocation3]  }
  0x11   :  { %86 = dma.done.wait [#allocation3], 256  }
  0x12   :  { %87 = vsyncadd [#allocation3], 4294967040  ;;  %s91_s18 = smov [#allocation5]   ;;  %v21_v0 = vld [vmem:[#allocation2] sm:$0xff]  ;;  %v22_v1 = vld [vmem:[#allocation2 + $0x8] sm:$0xff] }
  0x13   :  { %s31_s19 = sshll.u32 %s91_s18, 4  ;;  %23 = vst [vmem:[#allocation5] sm:$0xff] %v21_v0  ;;  %24 = vst [vmem:[#allocation5 + $0x8] sm:$0xff] %v22_v1  ;;  %s32_s19 = int_to_ptr.vmem [resolvable:$true] %s31_s19 }
  0x14   :  { %s64_s20 = scalar_lea.vmem %s32_s19, 256  ;;  %p69_p9 = scmp.lt.s32.totalorder %s32_s19, %s32_s19 }
  0x15   :  { %p65_p8 = scmp.ne.s32.totalorder %s32_s19, %s64_s20  ;;  %p70_p10 = scmp.lt.s32.totalorder %s64_s20, %s64_s20 }
  0x17   :  { %p71_p11 = por %p70_p10, %p69_p9 }
  0x19   :  { %p72_p12 = pnand %p71_p11, %p65_p8 }
  0x1b   :  { %75 = shalt.err (!%p72_p12)
}
  0x1c   :  { %s76_s0 = scalar_lea.hbm %s127_s1, 256 }
  0x1d   :  { %p77_p13 = scmp.ne.s32.totalorder %s127_s1, %s76_s0  ;;  %p80_p0 = scmp.lt.u32.totalorder %s76_s0, %s127_s1 }
  0x1f   :  { %p82_p1 = pnand %p80_p0, %p77_p13 }
  0x21   :  { %85 = shalt.err (!%p82_p1)
}
  0x22   :  { %34 = dma.vmem_to_hbm [thread:$0]  %s32_s19, 256, %s127_s1, [#allocation4]  }
  0x23   :  { %88 = dma.done.wait [#allocation4], 256  }
  0x24   :  { %89 = vsyncadd [#allocation4], 4294967040 }
  0x25   :  { %38 = vsyncpa [#allocation3], 1 }
  0x26   :  { %39 = vsyncpa [#allocation4], 1 }

</bundles_post_ra>
